<compile_context>
chip_gen: v5e
topology: v5e:2x2
jax: 0.10.0
libtpu: 0.0.40
codegen_flags: <defaults>
</compile_context>

<pallas_src>
import jax
import jax.numpy as jnp
from jax.experimental import pallas as pl
from jax.experimental.pallas import tpu as pltpu


def _make_ce_kernel(V, tile_v):
    """Online-logsumexp CE kernel over a vocab-chunked 'arbitrary' grid axis."""
    nv_static = pl.cdiv(V, tile_v)
    v_tail = V - (nv_static - 1) * tile_v          # valid lanes in the last vocab chunk
    needs_tail_mask = (v_tail != tile_v)           # only when V is not a multiple of tile_v

    def kernel(logits_ref, targets_ref, loss_ref, m_ref, l_ref, p_ref):
        vi = pl.program_id(1)
        nv = pl.num_programs(1)

        @pl.when(vi == 0)
        def _init():
            m_ref[...] = jnp.full(m_ref.shape, -jnp.inf, jnp.float32)
            l_ref[...] = jnp.zeros(l_ref.shape, jnp.float32)
            p_ref[...] = jnp.zeros(p_ref.shape, jnp.float32)

        def update(mask_tail):
            x = logits_ref[...].astype(jnp.float32)                     # (tile_n, tile_v)
            # Chunk-invariant lane iota; target index folded into chunk-local coordinates
            # (saves an O(tile_n*tile_v) add + full-tile iota per step).
            lane = jax.lax.broadcasted_iota(jnp.int32, (1, tile_v), 1)  # (1, tile_v)
            if mask_tail:
                x = jnp.where(lane < v_tail, x, -jnp.inf)               # kill padded tail lanes
            tgt_local = targets_ref[...] - vi * tile_v                  # (tile_n, 1)
            hit = lane == tgt_local                                     # (tile_n, tile_v)

            m_prev = m_ref[...]
            m_new = jnp.maximum(m_prev, jnp.max(x, axis=-1, keepdims=True))
            e = jnp.exp(x - m_new)                                      # EUP
            l_ref[...] = jnp.exp(m_prev - m_new) * l_ref[...] + jnp.sum(e, axis=-1, keepdims=True)
            p_ref[...] = p_ref[...] + jnp.sum(jnp.where(hit, x, 0.0), axis=-1, keepdims=True)
            m_ref[...] = m_new

        if not needs_tail_mask:
            update(False)
        else:
            # Hot chunks run the unmasked body; only the final chunk pays the lane mask.
            @pl.when(vi < nv - 1)
            def _body():
                update(False)

            @pl.when(vi == nv - 1)
            def _tail():
                update(True)

        @pl.when(vi == nv - 1)
        def _finalize():
            # per-row NLL = logsumexp(logits) - logits[target]
            loss_ref[...] = m_ref[...] + jnp.log(l_ref[...]) - p_ref[...]

    return kernel


def _vmem_capacity_bytes():
    try:
        return int(pltpu.get_tpu_info().vmem_capacity_bytes)
    except Exception:
        return 64 << 20  # conservative (v7x-sized) fallback


def _choose_tiles(N, V, itemsize, vmem_capacity):
    """Pick (tile_n, tile_v, vmem_limit) — generation-aware, no divisor requirements."""
    # Vocab chunking: wide chunks (long contiguous per-row DMA bursts, few grid steps).
    TILE_V_MAX = 8192
    tile_v = V if V <= TILE_V_MAX else TILE_V_MAX   # 8192 is a multiple of 128

    # Budget for the double-buffered logits block; the rest is headroom.
    on_small_vmem = vmem_capacity < (96 << 20)      # v7x: 64 MiB physical VMEM
    logits_budget = (24 << 20) if on_small_vmem else (48 << 20)
    vmem_clamp = (56 << 20) if on_small_vmem else (100 << 20)

    row_mult = 16 if itemsize < 4 else 8            # sub-32-bit dtypes pack 2 rows / sublane
    max_rows = max(row_mult, logits_budget // max(1, 2 * tile_v * itemsize))
    cap = min(4096, max_rows)
    cap = max(row_mult, (cap // row_mult) * row_mult)

    # Keep the row ("parallel") grid dim >= 2 so both v7x TensorCores get work.
    if N >= 2 * row_mult:
        cap = min(cap, max(row_mult, ((N // 2) // row_mult) * row_mult))

    if N <= row_mult:
        tile_n = N                                   # full-extent row block is always legal
    else:
        n_ceil = pl.cdiv(N, row_mult) * row_mult
        tile_n = min(cap, n_ceil)                    # multiple of row_mult; edge block masked

    # VMEM accounting: double-buffered logits + 128-lane-padded (tile_n, 1) buffers
    # (targets x2, output x2, 3 scratch) + headroom.
    small_buf = tile_n * 128 * 4
    vmem_bytes = 2 * tile_n * tile_v * itemsize + 7 * small_buf
    vmem_limit = int(min(max(vmem_bytes + (8 << 20), 16 << 20), vmem_clamp))
    return tile_n, tile_v, vmem_limit


def autoregressive_loss(predicted_logits, true_seq, *, ignore_index=-100):
    """predicted_logits: [B, S, V] float (f32 or, preferably, bf16); true_seq: [B, S] int.

    Returns the scalar mean cross-entropy (PyTorch nn.CrossEntropyLoss() defaults).
    """
    B, S, V = predicted_logits.shape
    N = B * S

    logits = predicted_logits.reshape(N, V)          # do NOT pre-cast: keep HBM traffic minimal
    targets = true_seq.reshape(N, 1).astype(jnp.int32)

    itemsize = jnp.dtype(logits.dtype).itemsize
    tile_n, tile_v, vmem_limit = _choose_tiles(N, V, itemsize, _vmem_capacity_bytes())

    grid = (pl.cdiv(N, tile_n), pl.cdiv(V, tile_v))  # ragged edges handled by Pallas, no padding

    per_row = pl.pallas_call(
        _make_ce_kernel(V, tile_v),
        out_shape=jax.ShapeDtypeStruct((N, 1), jnp.float32),
        grid_spec=pltpu.PrefetchScalarGridSpec(
            num_scalar_prefetch=0,
            grid=grid,
            in_specs=[
                pl.BlockSpec((tile_n, tile_v), lambda i, vi: (i, vi)),
                pl.BlockSpec((tile_n, 1), lambda i, vi: (i, 0)),
            ],
            out_specs=pl.BlockSpec((tile_n, 1), lambda i, vi: (i, 0)),
            scratch_shapes=[
                pltpu.VMEM((tile_n, 1), jnp.float32),   # running max m
                pltpu.VMEM((tile_n, 1), jnp.float32),   # running exp-sum l
                pltpu.VMEM((tile_n, 1), jnp.float32),   # picked target logit
            ],
        ),
        compiler_params=pltpu.CompilerParams(
            dimension_semantics=("parallel", "arbitrary"),
            vmem_limit_bytes=vmem_limit,
        ),
    )(logits, targets)

    # Final reduction in the wrapper: mean over valid rows (reduction='mean', ignore_index rows
    # excluded from numerator and denominator).
    per_row = per_row[:, 0]
    tgt_flat = true_seq.reshape(N).astype(jnp.int32)
    valid = tgt_flat != ignore_index
    count = jnp.maximum(jnp.sum(valid), 1).astype(jnp.float32)
    return jnp.sum(jnp.where(valid, per_row, 0.0)) / count


def _reference_loss(predicted_logits, true_seq):
    logits = predicted_logits.reshape(-1, predicted_logits.shape[-1]).astype(jnp.float32)
    tgt = true_seq.reshape(-1)
    logp = jax.nn.log_softmax(logits, axis=-1)
    nll = -jnp.take_along_axis(logp, tgt[:, None], axis=-1)[:, 0]
    return jnp.mean(nll)


if __name__ == "__main__":
    key = jax.random.PRNGKey(0)
    k1, k2, k3, k4, k5, k6, k7, k8 = jax.random.split(key, 8)

    # Case 1: small vocab, single vocab chunk (module's typical demo shape).
    B, S, V = 2, 8, 32
    logits1 = jax.random.normal(k1, (B, S, V), dtype=jnp.float32)
    tgt1 = jax.random.randint(k2, (B, S), 0, V, dtype=jnp.int32)
    loss1 = jax.block_until_ready(autoregressive_loss(logits1, tgt1))
    ref1 = _reference_loss(logits1, tgt1)
    assert jnp.allclose(loss1, ref1, atol=1e-5, rtol=1e-5), (loss1, ref1)

    # Case 2: ragged N (B*S not a multiple of the row tile) — exercises the no-pad edge-block path.
    B2, S2, V2 = 2, 9, 4096
    logits2 = jax.random.normal(k3, (B2, S2, V2), dtype=jnp.float32)
    tgt2 = jax.random.randint(k4, (B2, S2), 0, V2, dtype=jnp.int32)
    loss2 = jax.block_until_ready(autoregressive_loss(logits2, tgt2))
    ref2 = _reference_loss(logits2, tgt2)
    assert jnp.allclose(loss2, ref2, atol=1e-5, rtol=1e-5), (loss2, ref2)

    # Case 3: V > tile_v with a non-dividing tail (8320 = 8192 + 128) — exercises the masked
    # last vocab chunk of the online logsumexp.
    V3 = 8320
    logits3 = jax.random.normal(k5, (B, S, V3), dtype=jnp.float32)
    tgt3 = jax.random.randint(k6, (B, S), 0, V3, dtype=jnp.int32)
    loss3 = jax.block_until_ready(autoregressive_loss(logits3, tgt3))
    ref3 = _reference_loss(logits3, tgt3)
    assert jnp.allclose(loss3, ref3, atol=1e-5, rtol=1e-5), (loss3, ref3)

    # Case 4: vocab not a multiple of 128 (full-extent lane block, Mosaic-masked reductions).
    V4 = 1000
    logits4 = jax.random.normal(k7, (B, S, V4), dtype=jnp.float32)
    tgt4 = jax.random.randint(k8, (B, S), 0, V4, dtype=jnp.int32)
    loss4 = jax.block_until_ready(autoregressive_loss(logits4, tgt4))
    ref4 = _reference_loss(logits4, tgt4)
    assert jnp.allclose(loss4, ref4, atol=1e-5, rtol=1e-5), (loss4, ref4)

    print("KERNEL_OK")
</pallas_src>

<mosaic_0001>
module attributes {stable_mosaic.version = 11 : i64} {
  func.func @kernel(%arg0: i32, %arg1: i32, %arg2: memref<8x32xf32, #tpu.memory_space<vmem>>, %arg3: memref<8x1xi32, #tpu.memory_space<vmem>>, %arg4: memref<8x1xf32, #tpu.memory_space<vmem>>, %arg5: memref<8x1xf32, #tpu.memory_space<vmem>>, %arg6: memref<8x1xf32, #tpu.memory_space<vmem>>, %arg7: memref<8x1xf32, #tpu.memory_space<vmem>>) attributes {dimension_semantics = [#tpu.dimension_semantics<parallel>, #tpu.dimension_semantics<arbitrary>], iteration_bounds = array<i64: 2, 1>, scalar_prefetch = 0 : i64, scratch_operands = 3 : i64, tpu.core_type = #tpu.core_type<tc>, window_params = [{transform_indices = @transform_0, window_bounds = array<i64: 8, 32>}, {transform_indices = @transform_1, window_bounds = array<i64: 8, 1>}, {transform_indices = @transform_2, window_bounds = array<i64: 8, 1>}]} {
    %c0_i32 = arith.constant 0 : i32
    %0 = arith.cmpi eq, %arg1, %c0_i32 : i32
    %1 = arith.extui %0 : i1 to i32
    %c0_i32_0 = arith.constant 0 : i32
    %2 = arith.cmpi ne, %1, %c0_i32_0 : i32
    scf.if %2 {
      %cst_21 = arith.constant 0xFF800000 : f32
      %38 = vector.broadcast %cst_21 : f32 to vector<8x1xf32>
      %c0_22 = arith.constant 0 : index
      %c0_23 = arith.constant 0 : index
      %39 = vector.load %arg5[%c0_22, %c0_23] : memref<8x1xf32, #tpu.memory_space<vmem>>, vector<8x1xf32>
      tpu.vector_store %arg5[%c0_22, %c0_23], %38 {strides = array<i32>} : memref<8x1xf32, #tpu.memory_space<vmem>>, vector<8x1xf32>,
      %cst_24 = arith.constant 0.000000e+00 : f32
      %40 = vector.broadcast %cst_24 : f32 to vector<8x1xf32>
      %c0_25 = arith.constant 0 : index
      %c0_26 = arith.constant 0 : index
      %41 = vector.load %arg6[%c0_25, %c0_26] : memref<8x1xf32, #tpu.memory_space<vmem>>, vector<8x1xf32>
      tpu.vector_store %arg6[%c0_25, %c0_26], %40 {strides = array<i32>} : memref<8x1xf32, #tpu.memory_space<vmem>>, vector<8x1xf32>,
      %cst_27 = arith.constant 0.000000e+00 : f32
      %42 = vector.broadcast %cst_27 : f32 to vector<8x1xf32>
      %c0_28 = arith.constant 0 : index
      %c0_29 = arith.constant 0 : index
      %43 = vector.load %arg7[%c0_28, %c0_29] : memref<8x1xf32, #tpu.memory_space<vmem>>, vector<8x1xf32>
      tpu.vector_store %arg7[%c0_28, %c0_29], %42 {strides = array<i32>} : memref<8x1xf32, #tpu.memory_space<vmem>>, vector<8x1xf32>,
    } else {
    }
    %c0 = arith.constant 0 : index
    %c0_1 = arith.constant 0 : index
    %3 = vector.load %arg2[%c0, %c0_1] : memref<8x32xf32, #tpu.memory_space<vmem>>, vector<8x32xf32>
    %4 = tpu.iota {dimensions = array<i32: 1>} : vector<1x32xi32>
    %c0_2 = arith.constant 0 : index
    %c0_3 = arith.constant 0 : index
    %5 = vector.load %arg3[%c0_2, %c0_3] : memref<8x1xi32, #tpu.memory_space<vmem>>, vector<8x1xi32>
    %c32_i32 = arith.constant 32 : i32
    %6 = arith.muli %arg1, %c32_i32 : i32
    %7 = vector.broadcast %6 : i32 to vector<8x1xi32>
    %8 = arith.subi %5, %7 : vector<8x1xi32>
    %9 = vector.broadcast %4 : vector<1x32xi32> to vector<8x32xi32>
    %10 = vector.broadcast %8 : vector<8x1xi32> to vector<8x32xi32>
    %11 = arith.cmpi eq, %9, %10 : vector<8x32xi32>
    %c0_4 = arith.constant 0 : index
    %c0_5 = arith.constant 0 : index
    %12 = vector.load %arg5[%c0_4, %c0_5] : memref<8x1xf32, #tpu.memory_space<vmem>>, vector<8x1xf32>
    %cst = arith.constant dense<0xFF800000> : vector<8xf32>
    %13 = vector.multi_reduction <maximumf>, %3, %cst [1] : vector<8x32xf32> to vector<8xf32>
    %14 = vector.shape_cast %13 : vector<8xf32> to vector<8x1xf32>
    %15 = arith.maximumf %12, %14 : vector<8x1xf32>
    %16 = vector.broadcast %15 : vector<8x1xf32> to vector<8x32xf32>
    %17 = arith.subf %3, %16 : vector<8x32xf32>
    %18 = math.exp %17 : vector<8x32xf32>
    %19 = arith.subf %12, %15 : vector<8x1xf32>
    %20 = math.exp %19 : vector<8x1xf32>
    %c0_6 = arith.constant 0 : index
    %c0_7 = arith.constant 0 : index
    %21 = vector.load %arg6[%c0_6, %c0_7] : memref<8x1xf32, #tpu.memory_space<vmem>>, vector<8x1xf32>
    %22 = arith.mulf %20, %21 : vector<8x1xf32>
    %cst_8 = arith.constant dense<0.000000e+00> : vector<8xf32>
    %23 = vector.multi_reduction <add>, %18, %cst_8 [1] : vector<8x32xf32> to vector<8xf32>
    %24 = vector.shape_cast %23 : vector<8xf32> to vector<8x1xf32>
    %25 = arith.addf %22, %24 : vector<8x1xf32>
    %c0_9 = arith.constant 0 : index
    %c0_10 = arith.constant 0 : index
    %26 = vector.load %arg6[%c0_9, %c0_10] : memref<8x1xf32, #tpu.memory_space<vmem>>, vector<8x1xf32>
    tpu.vector_store %arg6[%c0_9, %c0_10], %25 {strides = array<i32>} : memref<8x1xf32, #tpu.memory_space<vmem>>, vector<8x1xf32>,
    %c0_11 = arith.constant 0 : index
    %c0_12 = arith.constant 0 : index
    %27 = vector.load %arg7[%c0_11, %c0_12] : memref<8x1xf32, #tpu.memory_space<vmem>>, vector<8x1xf32>
    %cst_13 = arith.constant 0.000000e+00 : f32
    %28 = vector.broadcast %cst_13 : f32 to vector<8x32xf32>
    %29 = arith.select %11, %3, %28 : vector<8x32xi1>, vector<8x32xf32>
    %cst_14 = arith.constant dense<0.000000e+00> : vector<8xf32>
    %30 = vector.multi_reduction <add>, %29, %cst_14 [1] : vector<8x32xf32> to vector<8xf32>
    %31 = vector.shape_cast %30 : vector<8xf32> to vector<8x1xf32>
    %32 = arith.addf %27, %31 : vector<8x1xf32>
    %c0_15 = arith.constant 0 : index
    %c0_16 = arith.constant 0 : index
    %33 = vector.load %arg7[%c0_15, %c0_16] : memref<8x1xf32, #tpu.memory_space<vmem>>, vector<8x1xf32>
    tpu.vector_store %arg7[%c0_15, %c0_16], %32 {strides = array<i32>} : memref<8x1xf32, #tpu.memory_space<vmem>>, vector<8x1xf32>,
    %c0_17 = arith.constant 0 : index
    %c0_18 = arith.constant 0 : index
    %34 = vector.load %arg5[%c0_17, %c0_18] : memref<8x1xf32, #tpu.memory_space<vmem>>, vector<8x1xf32>
    tpu.vector_store %arg5[%c0_17, %c0_18], %15 {strides = array<i32>} : memref<8x1xf32, #tpu.memory_space<vmem>>, vector<8x1xf32>,
    %c0_i32_19 = arith.constant 0 : i32
    %35 = arith.cmpi eq, %arg1, %c0_i32_19 : i32
    %36 = arith.extui %35 : i1 to i32
    %c0_i32_20 = arith.constant 0 : i32
    %37 = arith.cmpi ne, %36, %c0_i32_20 : i32
    scf.if %37 {
      %c0_21 = arith.constant 0 : index
      %c0_22 = arith.constant 0 : index
      %38 = vector.load %arg5[%c0_21, %c0_22] : memref<8x1xf32, #tpu.memory_space<vmem>>, vector<8x1xf32>
      %c0_23 = arith.constant 0 : index
      %c0_24 = arith.constant 0 : index
      %39 = vector.load %arg6[%c0_23, %c0_24] : memref<8x1xf32, #tpu.memory_space<vmem>>, vector<8x1xf32>
      %40 = math.log %39 : vector<8x1xf32>
      %41 = arith.addf %38, %40 : vector<8x1xf32>
      %c0_25 = arith.constant 0 : index
      %c0_26 = arith.constant 0 : index
      %42 = vector.load %arg7[%c0_25, %c0_26] : memref<8x1xf32, #tpu.memory_space<vmem>>, vector<8x1xf32>
      %43 = arith.subf %41, %42 : vector<8x1xf32>
      %c0_27 = arith.constant 0 : index
      %c0_28 = arith.constant 0 : index
      %44 = vector.load %arg4[%c0_27, %c0_28] : memref<8x1xf32, #tpu.memory_space<vmem>>, vector<8x1xf32>
      tpu.vector_store %arg4[%c0_27, %c0_28], %43 {strides = array<i32>} : memref<8x1xf32, #tpu.memory_space<vmem>>, vector<8x1xf32>,
    } else {
    }
    return
  }
  func.func @transform_0(%arg0: i32, %arg1: i32) -> (i32, i32) {
    %c0_i32 = arith.constant 0 : i32
    return %arg0, %arg1 : i32, i32
  }
  func.func @transform_1(%arg0: i32, %arg1: i32) -> (i32, i32) {
    %c0_i32 = arith.constant 0 : i32
    %c0_i32_0 = arith.constant 0 : i32
    return %arg0, %c0_i32 : i32, i32
  }
  func.func @transform_2(%arg0: i32, %arg1: i32) -> (i32, i32) {
    %c0_i32 = arith.constant 0 : i32
    %c0_i32_0 = arith.constant 0 : i32
    return %arg0, %c0_i32 : i32, i32
  }
}

</mosaic_0001>

<bundles_post_ra>
// kernel: tpu_custom_call.1
= control target key start
LH: loop header
LB: loop body
LE: loop exit
PB: predicated region body
PF: predicated region fallthrough
CT: control target
= control target key end

     0   :  { %s405_s9 = smov 0   ;;  %s407_s10 = smov 0   ;;  %s456_s0 = inlined_call_operand.vmem [shape: f32[16,32], index: 0, kind: input, shape index: {}]   ;;  %s457_s1 = inlined_call_operand.vmem [shape: s32[16,1], index: 1, kind: input, shape index: {}]   ;;  %s458_s2 = inlined_call_operand.vmem [shape: f32[16,1], index: 2, kind: output, shape index: {}]  }
   0x1   :  { %s409_s11 = smov 0  }
   0x2 LB: > { %s24_s12 = sadd.s32 1, %s381_s10  ;;  %p322_p0 = scmp.ge.s32.totalorder %s385_s11, 1  ;;  %s385_s11 = sphi %s409_s11, %s12_s11   ;;  %s381_s10 = sphi %s407_s10, %s460_s10   ;;  %s377_s9 = sphi %s405_s9, %s459_s9  }
   0x3   : > { %p26_p1 = scmp.ge.s32.totalorder %s24_s12, 2  ;;  %p137_p2 = scmp.lt.s32.totalorder %s385_s11, 3 }
   0x5   : > { %s462_s12 = smov (%p26_p1, %s24_s12), 0  ;;  %p138_p3 = pnand %p322_p0, %p137_p2 }
   0x6   : > { %p164_p4 = scmp.lt.s32.totalorder (!%p138_p3), %s377_s9, 1 }
   0x7   : > { %141 = sbr.rel (%p138_p3) target bundleno = 402 (0x192), region = 28 }
   0xc   : > { %vm183_vm0 = vcmask 7168   ;;  %v387_v0 = vmov -inf   ;;  %s464_s9 = smov (!%p164_p4, %s377_s9), 1  ;;  %vm199_vm1 = vcmask 261120   ;;  %v388_v3 = vmov 0  }
   0xd   : > { %184 = vst.msk [vmem:[#allocation2] sm:$0xff] %vm183_vm0, %v387_v0  ;;  %s424_s13 = sshll.u32 %s464_s9, 3  ;;  %355 = vset.pattern.permute.xlu0 %v388_v3  ;;  %356 = vset.pattern.permute.xlu1 %v388_v3  ;;  %v389_v4 = vmov 0.0   ;;  %v188_v10 = vlaneseq }
   0xe   : > { %s170_s16 = scalar_lea.vmem %s456_s0, %s424_s13  ;;  %185 = vst.msk [vmem:[#allocation3] sm:$0xff] %vm183_vm0, %v389_v4  ;;  %s174_s19 = scalar_lea.vmem %s457_s1, %s424_s13 }
   0xf   : > { %v187_v1 = vld [vmem:[%s170_s16] sm:$0xff]  ;;  %186 = vst.msk [vmem:[#allocation4] sm:$0xff] %vm183_vm0, %v389_v4  ;;  %v189_v12 = vand.u32 127, %v188_v10  ;;  %s178_s22 = scalar_lea.vmem %s458_s2, %s424_s13 }
  0x10   : > { %v200_v2 = vsel %vm199_vm1, %v187_v1, -inf  ;;  %v190_v5 = vld [vmem:[%s174_s19] sm:$0xff] }
  0x11   : > { %201 = vmax.xlane.f32.xlu0 %v200_v2  ;;  %195 = vperm.xlu1 %356, %v190_v5  }
  0x14   : > { %v198_v6 = vld [vmem:[#allocation2] sm:$0xff] }
  0x15   : > { %v215_v25 = vld [vmem:[#allocation3] sm:$0xff] }
  0x16   : > { %v223_v20 = vld [vmem:[#allocation4] sm:$0xff] }
  0x83   : > { %v196_v11 = vpop.permute.xlu1 %195 }
  0x84   : > { %v202_v7 = vpop.xlane.xlu0 %201  ;;  %vm197_vm2 = vcmp.eq.s32.totalorder %v189_v12, %v196_v11 }
  0x85   : > { %v203_v8 = vmax.f32 %v198_v6, %v202_v7  ;;  %v224_v13 = vsel %vm197_vm2, %v187_v1, 0.0 }
  0x86   : > { %v225_v14 = vsel %vm199_vm1, %v224_v13, 0.0 }
  0x87   : > { %v212_v9 = vsub.f32 %v198_v6, %v203_v8  ;;  %230 = vst.msk [vmem:[#allocation2] sm:$0xff] %vm183_vm0, %v203_v8  ;;  %206 = vperm.xlu0 %355, %v203_v8   ;;  %226 = vadd.xlane.f32.xlu2 %v225_v14 }
  0x89   : > { %v213_v23 = vmul.f32 1.442695, %v212_v9 }
  0x8e   : > { %v234_v32 = vld [vmem:[#allocation2] sm:$0xff] }
  0xf9   : > { %v207_v15 = vpop.permute.xlu0 %206 }
  0xfa   : > { %v209_v16 = vsub.f32 %v187_v1, %v207_v15  ;;  %v227_v21 = vpop.xlane.xlu2 %226 }
  0xfb   : > { %v228_v22 = vadd.f32 %v227_v21, %v223_v20 }
  0xfc   : > { %v210_v17 = vmul.f32 1.442695, %v209_v16 }
  0xfd   : > { %229 = vst.msk [vmem:[#allocation4] sm:$0xff] %vm183_vm0, %v228_v22 }
  0xfe   : > { %357 = vpow2.f32 %v210_v17 }
  0xff   : > { %359 = vpow2.f32 %v213_v23 }
 0x104   : > { %v358_v18 = vpop.eup %357  ;;  %v239_v33 = vld [vmem:[#allocation4] sm:$0xff] }
 0x105   : > { %v217_v19 = vsel %vm199_vm1, %v358_v18, 0.0  ;;  %v360_v24 = vpop.eup %359 }
 0x106   : > { %218 = vadd.xlane.f32.xlu1 %v217_v19  ;;  %v216_v26 = vmul.f32 %v360_v24, %v215_v25 }
 0x179   : > { %v219_v27 = vpop.xlane.xlu1 %218 }
 0x17a   : > { %v220_v28 = vadd.f32 %v219_v27, %v216_v26 }
 0x17c   : > { %222 = vst.msk [vmem:[#allocation3] sm:$0xff] %vm183_vm0, %v220_v28 }
 0x183   : > { %v235_v29 = vld [vmem:[#allocation3] sm:$0xff] }
 0x184   : > { %361 = vlog2.f32 %v235_v29 }
 0x18a   : > { %v362_v30 = vpop.eup %361 }
 0x18b   : > { %v237_v31 = vmul.f32 0.6931472, %v362_v30 }
 0x18d   : > { %v238_v34 = vadd.f32 %v237_v31, %v234_v32 }
 0x18f   : > { %v240_v35 = vsub.f32 %v238_v34, %v239_v33 }
 0x191   : > { %241 = vst.msk [vmem:[%s178_s22] sm:$0xff] %vm183_vm0, %v240_v35 }
 0x192 PF: > { %s12_s11 = sadd.s32 1, %s385_s11   ;;  %s459_s9 = smov %s381_s10 }
 0x193   : > { %p9_p5 = scmp.ge.s32.totalorder %s12_s11, 4   ;;  %s460_s10 = smov %s462_s12 }
 0x195   :  { %11 = sbr.rel (!%p9_p5) target bundleno = 2 (0x2), region = 69 }

</bundles_post_ra>
